<compile_context>
chip_gen: v7x
topology: tpu7x:2x2x1
jax: 0.10.0
libtpu: 0.0.40
codegen_flags: <defaults>
</compile_context>

<pallas_src>
import math

import jax
import jax.numpy as jnp
from jax.experimental import pallas as pl
from jax.experimental.pallas import tpu as pltpu


def _round_up(x: int, m: int) -> int:
    return (x + m - 1) // m * m


def _vmem_limit_bytes() -> int:
    """~80% of physical VMEM, clamped to a sane range (works v5e/v6e/v7x)."""
    try:
        cap = int(pltpu.get_tpu_info().vmem_capacity_bytes)
    except Exception:
        cap = 64 * 1024 * 1024  # conservative fallback (v7x per-TC size)
    return int(min(max(cap * 4 // 5, 32 * 1024 * 1024), 112 * 1024 * 1024))


# --------------------------------------------------------------------------
# Kernel body: two bf16 MXU matmuls with f32 accumulation, bias + ReLU on VPU.
# --------------------------------------------------------------------------
def esm_projector_kernel(x_ref, w1_ref, b1_ref, w2_ref, b2_ref, o_ref):
    # Cast the f32 input tile to bf16 in-register (MXU input precision).
    x = x_ref[...].astype(w1_ref.dtype)
    h = jnp.dot(x, w1_ref[...], preferred_element_type=jnp.float32)
    h = jnp.maximum(h + b1_ref[...], 0.0)                  # (tile_n, hid_p)
    # Dropout: identity at inference.
    # Linear2 with BatchNorm1d (running stats) + b2 pre-folded into W2'/b2'.
    y = jnp.dot(h.astype(w2_ref.dtype), w2_ref[...],
                preferred_element_type=jnp.float32)
    o_ref[...] = jnp.maximum(y + b2_ref[...], 0.0).astype(o_ref.dtype)


# --------------------------------------------------------------------------
# One-time parameter preparation (hoisted out of the per-call path).
# --------------------------------------------------------------------------
def prepare_esm_projector_params(params, *, weight_dtype=jnp.bfloat16):
    """Fold BN running stats + b2 into Linear2, pad hidden/proj dims (only if
    already >= 128), cast weights to bf16. Call once; reuse across forwards.
    Returns (w1p, b1p, w2p, b2p, proj)."""
    w1, b1, w2, b2, gamma, beta, run_mean, run_var, eps = params
    esm_dim, hidden = w1.shape
    proj = w2.shape[1]

    scale = gamma / jnp.sqrt(run_var + eps)                # (proj,)
    shift = beta - run_mean * scale                        # (proj,)
    w2f = w2 * scale[None, :]                              # (hidden, proj)
    b2f = b2 * scale + shift                               # (proj,)

    # 128-pad hidden/proj only when they are large enough that lane-dense
    # stores / MXU alignment pay for the extra bytes; tiny dims stay as-is
    # (full-extent blocks are legal without 128-padding).
    hid_p = _round_up(hidden, 128) if hidden >= 128 else hidden
    proj_p = _round_up(proj, 128) if proj >= 128 else proj
    if hid_p != hidden:
        w1 = jnp.pad(w1, ((0, 0), (0, hid_p - hidden)))
        b1 = jnp.pad(b1, (0, hid_p - hidden))
        w2f = jnp.pad(w2f, ((0, hid_p - hidden), (0, 0)))
    if proj_p != proj:
        w2f = jnp.pad(w2f, ((0, 0), (0, proj_p - proj)))
        b2f = jnp.pad(b2f, (0, proj_p - proj))

    w1p = w1.astype(weight_dtype)                          # (esm_dim, hid_p)
    w2p = w2f.astype(weight_dtype)                         # (hid_p, proj_p)
    b1p = b1.reshape(1, hid_p).astype(jnp.float32)
    b2p = b2f.reshape(1, proj_p).astype(jnp.float32)
    return (w1p, b1p, w2p, b2p, proj)


# --------------------------------------------------------------------------
# pallas_call wrapper.
# --------------------------------------------------------------------------
def _pallas_forward(x, w1p, b1p, w2p, b2p, *, tile_n, out_dtype, vmem_limit,
                    single_buffer_weights):
    n, esm_dim = x.shape
    hid_p = w1p.shape[1]
    proj_p = w2p.shape[1]
    # Constant-index weights: single-buffer them (their block never changes).
    w_kw = dict(pipeline_mode=pl.Buffered(1)) if single_buffer_weights else {}

    grid = (pl.cdiv(n, tile_n),)
    return pl.pallas_call(
        esm_projector_kernel,
        out_shape=jax.ShapeDtypeStruct((n, proj_p), out_dtype),
        grid_spec=pltpu.PrefetchScalarGridSpec(
            num_scalar_prefetch=0,
            grid=grid,
            in_specs=[
                # x: row tile, full-extent feature dim (no padded copy of x).
                pl.BlockSpec((tile_n, esm_dim), lambda i: (i, 0)),
                pl.BlockSpec((esm_dim, hid_p), lambda i: (0, 0), **w_kw),
                pl.BlockSpec((1, hid_p), lambda i: (0, 0), **w_kw),
                pl.BlockSpec((hid_p, proj_p), lambda i: (0, 0), **w_kw),
                pl.BlockSpec((1, proj_p), lambda i: (0, 0), **w_kw),
            ],
            out_specs=pl.BlockSpec((tile_n, proj_p), lambda i: (i, 0)),
        ),
        compiler_params=pltpu.CompilerParams(
            dimension_semantics=("parallel",),
            vmem_limit_bytes=vmem_limit,
        ),
    )(x, w1p, b1p, w2p, b2p)


def esm_projector_forward(x, prepared, *, tile_n=None, out_dtype=jnp.float32):
    """x: (N, esm_dim) float32 -> (N, projection_dim) in `out_dtype`.

    `prepared` comes from prepare_esm_projector_params (computed once).
    `out_dtype=jnp.bfloat16` halves output HBM traffic if downstream allows.
    """
    w1p, b1p, w2p, b2p, proj = prepared
    n, esm_dim = x.shape
    hid_p = w1p.shape[1]
    proj_p = w2p.shape[1]
    vmem_limit = _vmem_limit_bytes()

    # ---- Row-tile selection -------------------------------------------------
    if tile_n is None:
        tile_n = 1024                       # amortizes per-step overhead
    tile_n = max(8, min(int(tile_n), _round_up(n, 8)))
    if n >= 256:
        # Guarantee >= 2 row tiles so the 'parallel' axis can shard across
        # both TensorCores on v7x (no effect on v5e/v6e).
        tile_n = min(tile_n, _round_up(pl.cdiv(n, 2), 128))
    tile_n = _round_up(tile_n, 128 if n >= 128 else 8)

    # Shrink tile_n if the double-buffered footprint would blow the budget:
    # 2x x-tile (f32) + 2x out-tile + resident weights + f32 h intermediate.
    out_bytes = jnp.dtype(out_dtype).itemsize

    def footprint(t):
        return (2 * t * esm_dim * x.dtype.itemsize
                + 2 * t * proj_p * out_bytes
                + w1p.size * w1p.dtype.itemsize
                + w2p.size * w2p.dtype.itemsize
                + (b1p.size + b2p.size) * 4
                + t * hid_p * 4)

    while tile_n > 128 and footprint(tile_n) > int(vmem_limit * 0.7):
        tile_n = max(128, tile_n // 2)

    # ---- Kernel call (fallback to default buffering if Buffered(1) rejected).
    kwargs = dict(tile_n=tile_n, out_dtype=out_dtype, vmem_limit=vmem_limit)
    try:
        out = _pallas_forward(x, w1p, b1p, w2p, b2p,
                              single_buffer_weights=True, **kwargs)
    except Exception:
        out = _pallas_forward(x, w1p, b1p, w2p, b2p,
                              single_buffer_weights=False, **kwargs)

    if proj_p != proj:
        out = out[:, :proj]
    return out


# --------------------------------------------------------------------------
# Init + pure-JAX reference for correctness.
# --------------------------------------------------------------------------
def init_params(key, esm_dim, projection_dim):
    """Deterministic init (PyTorch-default-style) with non-trivial BN stats."""
    hidden = projection_dim * 2
    k1, k2, k3, k4, k5, k6, k7, k8 = jax.random.split(key, 8)

    bound1 = 1.0 / math.sqrt(esm_dim)
    w1 = jax.random.uniform(k1, (esm_dim, hidden), jnp.float32, -bound1, bound1)
    b1 = jax.random.uniform(k2, (hidden,), jnp.float32, -bound1, bound1)

    bound2 = 1.0 / math.sqrt(hidden)
    w2 = jax.random.uniform(k3, (hidden, projection_dim), jnp.float32, -bound2, bound2)
    b2 = jax.random.uniform(k4, (projection_dim,), jnp.float32, -bound2, bound2)

    gamma = jax.random.uniform(k5, (projection_dim,), jnp.float32, 0.8, 1.2)
    beta = 0.1 * jax.random.normal(k6, (projection_dim,), jnp.float32)
    run_mean = 0.1 * jax.random.normal(k7, (projection_dim,), jnp.float32)
    run_var = jax.random.uniform(k8, (projection_dim,), jnp.float32, 0.5, 1.5)
    eps = jnp.float32(1e-5)
    return (w1, b1, w2, b2, gamma, beta, run_mean, run_var, eps)


def reference_forward(x, params):
    w1, b1, w2, b2, gamma, beta, run_mean, run_var, eps = params
    h = jnp.maximum(x @ w1 + b1, 0.0)
    y = h @ w2 + b2
    y = (y - run_mean) / jnp.sqrt(run_var + eps) * gamma + beta
    return jnp.maximum(y, 0.0)


if __name__ == "__main__":
    # Small shapes consistent with the module. N not a multiple of the row
    # tile so the masked boundary-tile path is exercised; tile_n=8 gives a
    # multi-step grid.
    N = 20           # number of residues / rows
    ESM_DIM = 32     # esm_dim
    PROJ_DIM = 16    # projection_dim  (hidden = 32)

    key = jax.random.PRNGKey(0)
    k_x, k_p = jax.random.split(key)
    x = jax.random.normal(k_x, (N, ESM_DIM), jnp.float32)
    params = init_params(k_p, ESM_DIM, PROJ_DIM)

    prepared = prepare_esm_projector_params(params)   # one-time weight prep
    out = esm_projector_forward(x, prepared, tile_n=8)
    out = jax.block_until_ready(out)

    ref = reference_forward(x, params)
    assert out.shape == (N, PROJ_DIM)
    # bf16 MXU inputs (f32 accumulation) vs f32 reference: loose tolerance.
    assert jnp.allclose(out, ref, atol=5e-2, rtol=5e-2), "mismatch vs reference"

    print("KERNEL_OK")
</pallas_src>

<mosaic_0001>
module attributes {stable_mosaic.version = 11 : i64} {
  func.func @esm_projector_kernel(%arg0: i32, %arg1: memref<8x32xf32, #tpu.memory_space<vmem>>, %arg2: memref<32x32xbf16, #tpu.memory_space<vmem>>, %arg3: memref<1x32xf32, #tpu.memory_space<vmem>>, %arg4: memref<32x16xbf16, #tpu.memory_space<vmem>>, %arg5: memref<1x16xf32, #tpu.memory_space<vmem>>, %arg6: memref<8x16xf32, #tpu.memory_space<vmem>>) attributes {dimension_semantics = [#tpu.dimension_semantics<parallel>], iteration_bounds = array<i64: 3>, scalar_prefetch = 0 : i64, scratch_operands = 0 : i64, tpu.core_type = #tpu.core_type<tc>, window_params = [{transform_indices = @transform_0, window_bounds = array<i64: 8, 32>}, {pipeline_mode = #tpu.pipeline_mode<synchronous>, transform_indices = @transform_1, window_bounds = array<i64: 32, 32>}, {pipeline_mode = #tpu.pipeline_mode<synchronous>, transform_indices = @transform_2, window_bounds = array<i64: 1, 32>}, {pipeline_mode = #tpu.pipeline_mode<synchronous>, transform_indices = @transform_3, window_bounds = array<i64: 32, 16>}, {pipeline_mode = #tpu.pipeline_mode<synchronous>, transform_indices = @transform_4, window_bounds = array<i64: 1, 16>}, {transform_indices = @transform_5, window_bounds = array<i64: 8, 16>}]} {
    %c0 = arith.constant 0 : index
    %c0_0 = arith.constant 0 : index
    %0 = vector.load %arg1[%c0, %c0_0] : memref<8x32xf32, #tpu.memory_space<vmem>>, vector<8x32xf32>
    %1 = arith.truncf %0 : vector<8x32xf32> to vector<8x32xbf16>
    %c0_1 = arith.constant 0 : index
    %c0_2 = arith.constant 0 : index
    %2 = vector.load %arg2[%c0_1, %c0_2] : memref<32x32xbf16, #tpu.memory_space<vmem>>, vector<32x32xbf16>
    %cst = arith.constant dense<0.000000e+00> : vector<8x32xf32>
    %3 = tpu.matmul %1, %2, %cst {dimension_numbers = #tpu.dot_dimension_numbers<[1], [0], [0], [1], [0, 0, 1, 1], [], []>} : vector<8x32xbf16>, vector<32x32xbf16>, vector<8x32xf32> -> vector<8x32xf32>
    %c0_3 = arith.constant 0 : index
    %c0_4 = arith.constant 0 : index
    %4 = vector.load %arg3[%c0_3, %c0_4] : memref<1x32xf32, #tpu.memory_space<vmem>>, vector<1x32xf32>
    %5 = vector.broadcast %4 : vector<1x32xf32> to vector<8x32xf32>
    %6 = arith.addf %3, %5 : vector<8x32xf32>
    %cst_5 = arith.constant 0.000000e+00 : f32
    %7 = vector.broadcast %cst_5 : f32 to vector<8x32xf32>
    %8 = arith.maximumf %6, %7 : vector<8x32xf32>
    %9 = arith.truncf %8 : vector<8x32xf32> to vector<8x32xbf16>
    %c0_6 = arith.constant 0 : index
    %c0_7 = arith.constant 0 : index
    %10 = vector.load %arg4[%c0_6, %c0_7] : memref<32x16xbf16, #tpu.memory_space<vmem>>, vector<32x16xbf16>
    %cst_8 = arith.constant dense<0.000000e+00> : vector<8x16xf32>
    %11 = tpu.matmul %9, %10, %cst_8 {dimension_numbers = #tpu.dot_dimension_numbers<[1], [0], [0], [1], [0, 0, 1, 1], [], []>} : vector<8x32xbf16>, vector<32x16xbf16>, vector<8x16xf32> -> vector<8x16xf32>
    %c0_9 = arith.constant 0 : index
    %c0_10 = arith.constant 0 : index
    %12 = vector.load %arg5[%c0_9, %c0_10] : memref<1x16xf32, #tpu.memory_space<vmem>>, vector<1x16xf32>
    %13 = vector.broadcast %12 : vector<1x16xf32> to vector<8x16xf32>
    %14 = arith.addf %11, %13 : vector<8x16xf32>
    %cst_11 = arith.constant 0.000000e+00 : f32
    %15 = vector.broadcast %cst_11 : f32 to vector<8x16xf32>
    %16 = arith.maximumf %14, %15 : vector<8x16xf32>
    %c0_12 = arith.constant 0 : index
    %c0_13 = arith.constant 0 : index
    %17 = vector.load %arg6[%c0_12, %c0_13] : memref<8x16xf32, #tpu.memory_space<vmem>>, vector<8x16xf32>
    tpu.vector_store %arg6[%c0_12, %c0_13], %16 {strides = array<i32>} : memref<8x16xf32, #tpu.memory_space<vmem>>, vector<8x16xf32>,
    return
  }
  func.func @transform_0(%arg0: i32) -> (i32, i32) {
    %c0_i32 = arith.constant 0 : i32
    %c0_i32_0 = arith.constant 0 : i32
    return %arg0, %c0_i32 : i32, i32
  }
  func.func @transform_1(%arg0: i32) -> (i32, i32) {
    %c0_i32 = arith.constant 0 : i32
    %c0_i32_0 = arith.constant 0 : i32
    %c0_i32_1 = arith.constant 0 : i32
    return %c0_i32, %c0_i32_0 : i32, i32
  }
  func.func @transform_2(%arg0: i32) -> (i32, i32) {
    %c0_i32 = arith.constant 0 : i32
    %c0_i32_0 = arith.constant 0 : i32
    %c0_i32_1 = arith.constant 0 : i32
    return %c0_i32, %c0_i32_0 : i32, i32
  }
  func.func @transform_3(%arg0: i32) -> (i32, i32) {
    %c0_i32 = arith.constant 0 : i32
    %c0_i32_0 = arith.constant 0 : i32
    %c0_i32_1 = arith.constant 0 : i32
    return %c0_i32, %c0_i32_0 : i32, i32
  }
  func.func @transform_4(%arg0: i32) -> (i32, i32) {
    %c0_i32 = arith.constant 0 : i32
    %c0_i32_0 = arith.constant 0 : i32
    %c0_i32_1 = arith.constant 0 : i32
    return %c0_i32, %c0_i32_0 : i32, i32
  }
  func.func @transform_5(%arg0: i32) -> (i32, i32) {
    %c0_i32 = arith.constant 0 : i32
    %c0_i32_0 = arith.constant 0 : i32
    return %arg0, %c0_i32 : i32, i32
  }
}

module attributes {stable_mosaic.version = 11 : i64} {
  func.func @esm_projector_kernel(%arg0: i32, %arg1: memref<8x32xf32, #tpu.memory_space<vmem>>, %arg2: memref<32x32xbf16, #tpu.memory_space<vmem>>, %arg3: memref<1x32xf32, #tpu.memory_space<vmem>>, %arg4: memref<32x16xbf16, #tpu.memory_space<vmem>>, %arg5: memref<1x16xf32, #tpu.memory_space<vmem>>, %arg6: memref<8x16xf32, #tpu.memory_space<vmem>>) attributes {dimension_semantics = [#tpu.dimension_semantics<parallel>], iteration_bounds = array<i64: 3>, scalar_prefetch = 0 : i64, scratch_operands = 0 : i64, tpu.core_type = #tpu.core_type<tc>, window_params = [{transform_indices = @transform_0, window_bounds = array<i64: 8, 32>}, {pipeline_mode = #tpu.pipeline_mode<synchronous>, transform_indices = @transform_1, window_bounds = array<i64: 32, 32>}, {pipeline_mode = #tpu.pipeline_mode<synchronous>, transform_indices = @transform_2, window_bounds = array<i64: 1, 32>}, {pipeline_mode = #tpu.pipeline_mode<synchronous>, transform_indices = @transform_3, window_bounds = array<i64: 32, 16>}, {pipeline_mode = #tpu.pipeline_mode<synchronous>, transform_indices = @transform_4, window_bounds = array<i64: 1, 16>}, {transform_indices = @transform_5, window_bounds = array<i64: 8, 16>}]} {
    %c0 = arith.constant 0 : index
    %c0_0 = arith.constant 0 : index
    %0 = vector.load %arg1[%c0, %c0_0] : memref<8x32xf32, #tpu.memory_space<vmem>>, vector<8x32xf32>
    %1 = arith.truncf %0 : vector<8x32xf32> to vector<8x32xbf16>
    %c0_1 = arith.constant 0 : index
    %c0_2 = arith.constant 0 : index
    %2 = vector.load %arg2[%c0_1, %c0_2] : memref<32x32xbf16, #tpu.memory_space<vmem>>, vector<32x32xbf16>
    %cst = arith.constant dense<0.000000e+00> : vector<8x32xf32>
    %3 = tpu.matmul %1, %2, %cst {dimension_numbers = #tpu.dot_dimension_numbers<[1], [0], [0], [1], [0, 0, 1, 1], [], []>} : vector<8x32xbf16>, vector<32x32xbf16>, vector<8x32xf32> -> vector<8x32xf32>
    %c0_3 = arith.constant 0 : index
    %c0_4 = arith.constant 0 : index
    %4 = vector.load %arg3[%c0_3, %c0_4] : memref<1x32xf32, #tpu.memory_space<vmem>>, vector<1x32xf32>
    %5 = vector.broadcast %4 : vector<1x32xf32> to vector<8x32xf32>
    %6 = arith.addf %3, %5 : vector<8x32xf32>
    %cst_5 = arith.constant 0.000000e+00 : f32
    %7 = vector.broadcast %cst_5 : f32 to vector<8x32xf32>
    %8 = arith.maximumf %6, %7 : vector<8x32xf32>
    %9 = arith.truncf %8 : vector<8x32xf32> to vector<8x32xbf16>
    %c0_6 = arith.constant 0 : index
    %c0_7 = arith.constant 0 : index
    %10 = vector.load %arg4[%c0_6, %c0_7] : memref<32x16xbf16, #tpu.memory_space<vmem>>, vector<32x16xbf16>
    %cst_8 = arith.constant dense<0.000000e+00> : vector<8x16xf32>
    %11 = tpu.matmul %9, %10, %cst_8 {dimension_numbers = #tpu.dot_dimension_numbers<[1], [0], [0], [1], [0, 0, 1, 1], [], []>} : vector<8x32xbf16>, vector<32x16xbf16>, vector<8x16xf32> -> vector<8x16xf32>
    %c0_9 = arith.constant 0 : index
    %c0_10 = arith.constant 0 : index
    %12 = vector.load %arg5[%c0_9, %c0_10] : memref<1x16xf32, #tpu.memory_space<vmem>>, vector<1x16xf32>
    %13 = vector.broadcast %12 : vector<1x16xf32> to vector<8x16xf32>
    %14 = arith.addf %11, %13 : vector<8x16xf32>
    %cst_11 = arith.constant 0.000000e+00 : f32
    %15 = vector.broadcast %cst_11 : f32 to vector<8x16xf32>
    %16 = arith.maximumf %14, %15 : vector<8x16xf32>
    %c0_12 = arith.constant 0 : index
    %c0_13 = arith.constant 0 : index
    %17 = vector.load %arg6[%c0_12, %c0_13] : memref<8x16xf32, #tpu.memory_space<vmem>>, vector<8x16xf32>
    tpu.vector_store %arg6[%c0_12, %c0_13], %16 {strides = array<i32>} : memref<8x16xf32, #tpu.memory_space<vmem>>, vector<8x16xf32>,
    return
  }
  func.func @transform_0(%arg0: i32) -> (i32, i32) {
    %c0_i32 = arith.constant 0 : i32
    %c0_i32_0 = arith.constant 0 : i32
    return %arg0, %c0_i32 : i32, i32
  }
  func.func @transform_1(%arg0: i32) -> (i32, i32) {
    %c0_i32 = arith.constant 0 : i32
    %c0_i32_0 = arith.constant 0 : i32
    %c0_i32_1 = arith.constant 0 : i32
    return %c0_i32, %c0_i32_0 : i32, i32
  }
  func.func @transform_2(%arg0: i32) -> (i32, i32) {
    %c0_i32 = arith.constant 0 : i32
    %c0_i32_0 = arith.constant 0 : i32
    %c0_i32_1 = arith.constant 0 : i32
    return %c0_i32, %c0_i32_0 : i32, i32
  }
  func.func @transform_3(%arg0: i32) -> (i32, i32) {
    %c0_i32 = arith.constant 0 : i32
    %c0_i32_0 = arith.constant 0 : i32
    %c0_i32_1 = arith.constant 0 : i32
    return %c0_i32, %c0_i32_0 : i32, i32
  }
  func.func @transform_4(%arg0: i32) -> (i32, i32) {
    %c0_i32 = arith.constant 0 : i32
    %c0_i32_0 = arith.constant 0 : i32
    %c0_i32_1 = arith.constant 0 : i32
    return %c0_i32, %c0_i32_0 : i32, i32
  }
  func.func @transform_5(%arg0: i32) -> (i32, i32) {
    %c0_i32 = arith.constant 0 : i32
    %c0_i32_0 = arith.constant 0 : i32
    return %arg0, %c0_i32 : i32, i32
  }
}

</mosaic_0001>

<bundles_post_ra>
// kernel: tpu_custom_call.1
= control target key start
LH: loop header
LB: loop body
LE: loop exit
PB: predicated region body
PF: predicated region fallthrough
CT: control target
= control target key end

     0   :  { %10 = vsyncpa [#allocation3], 0  ;;  %s584_s18 = smov 0   ;;  %s659_s0 = inlined_call_operand.vmem [shape: f32[20,32], index: 0, kind: input, shape index: {}]   ;;  %s660_s1 = inlined_call_operand.hbm [shape: bf16[32,32], index: 1, kind: input, shape index: {}]   ;;  %s661_s2 = inlined_call_operand.vmem [shape: f32[1,32], index: 2, kind: input, shape index: {}]   ;;  %s662_s3 = inlined_call_operand.vmem [shape: bf16[32,16], index: 3, kind: input, shape index: {}]   ;;  %s663_s4 = inlined_call_operand.vmem [shape: f32[1,16], index: 4, kind: input, shape index: {}]   ;;  %s664_s5 = inlined_call_operand.vmem [shape: f32[20,16], index: 5, kind: output, shape index: {}]  }
   0x1 LB: > { %s590_s19 = sadd.s32 4294967295, %s547_s18   ;;  %p443_p0 = scmp.ge.s32.totalorder %s547_s18, 1  ;;  %s547_s18 = sphi %s584_s18, %s16_s18  }
   0x2   : > { %p157_p1 = scmp.lt.s32.totalorder %s547_s18, 4  ;;  %s549_s20 = smov [#allocation2]  }
   0x3   : > { %s169_s21 = sshll.u32 %s549_s20, 4  ;;  %p665_p3 = scmp.eq.s32.totalorder %s590_s19, 0  ;;  %s170_s21 = int_to_ptr.vmem [resolvable:$true] %s169_s21 }
   0x4   : > { %p594_p2 = pnand %p443_p0, %p157_p1  ;;  %s509_s26 = scalar_lea.hbm %s660_s1, 256 }
   0x5   : > { %p510_p6 = scmp.ne.s32.totalorder %s660_s1, %s509_s26  ;;  %p516_p10 = scmp.lt.u32.totalorder %s509_s26, %s660_s1 }
   0x6   : > { %s667_s22 = scalar_select %p594_p2, 1, 0 }
   0x7   : > { %p486_p4 = pneg %p594_p2 }
   0x9   : > { %p603_p5 = pnand %p665_p3, %p486_p4 }
   0xb   : > { %p511_p7 = pneg %p603_p5 }
   0xd   : > { %p512_p8 = pnand %p511_p7, %p510_p6 }
   0xf   : > { %p513_p9 = pneg %p512_p8 }
  0x11   : > { %p518_p11 = pnand %p516_p10, %p513_p9 }
  0x13   : > { %521 = shalt.err (!%p518_p11)
}
  0x14   : > { %s522_s6 = scalar_lea.vmem %s170_s21, 256  ;;  %p530_p1 = scmp.lt.s32.totalorder %s170_s21, %s170_s21 }
  0x15   : > { %p523_p12 = scmp.ne.s32.totalorder %s170_s21, %s522_s6  ;;  %p531_p4 = scmp.lt.s32.totalorder %s522_s6, %s522_s6 }
  0x17   : > { %p525_p13 = pnand %p523_p12, %p511_p7  ;;  %p532_p3 = por %p531_p4, %p530_p1 }
  0x19   : > { %p526_p0 = pneg %p525_p13 }
  0x1b   : > { %p533_p2 = pnand %p532_p3, %p526_p0 }
  0x1d   : > { %536 = shalt.err (!%p533_p2)
}
  0x1e   : > { %s550_s7 = smov 64   ;;  %s551_s8 = smov 4  }
  0x1f   : > { %489 = dma.hbm_to_vmem [thread:$0]  (!%p603_p5), %s660_s1, 256, %s170_s21, [#allocation3], %s550_s7, %s550_s7, %s551_s8  }
  0x20   : > { %p669_p6 = scmp.ne.s32.totalorder %s667_s22, 0 }
  0x21   : > { %p670_p8 = scmp.eq.s32.totalorder (!%p669_p6), %s590_s19, 0 }
  0x22   : > { %201 = sbr.rel (%p669_p6) target bundleno = 487 (0x1e7), region = 40 }
  0x29   : > { %542 = dma.done.wait (%p670_p8), [#allocation3], 256   ;;  %p671_p7 = pmov %p670_p8 }
  0x2a   : > { %p227_p2 = scmp.lt.s32.totalorder %s590_s19, 2  ;;  %v552_v0 = vmov 0.0   ;;  %vm553_vm0 = vmmov 0   ;;  %v505_v1 = vld [vmem:[#allocation2] sm:$0xff]   ;;  %v506_v2 = vld [vmem:[#allocation2 + $0x8] sm:$0xff]   ;;  %vm261_vm1 = vcmask 261120  }
  0x2b   : > { %544 = vsyncadd (%p671_p7), [#allocation3], 4294967040  ;;  %466 = vmatprep.subr.bf16.mxu0 %v552_v0  ;;  %470 = vmatprep.mubr.msk.bf16.mxu0 %vm553_vm0, %v552_v0  ;;  %v507_v5 = vld [vmem:[%s662_s3] sm:$0xff]   ;;  %v508_v6 = vld [vmem:[%s662_s3 + $0x8] sm:$0xff]   ;;  %vm374_vm2 = vcmask 130048  }
  0x2c   : > { %s673_s19 = smov (!%p227_p2, %s590_s19), 2  ;;  %474 = vmatprep.subr.bf16.mxu1 %v552_v0  ;;  %478 = vmatprep.mubr.msk.bf16.mxu1 %vm553_vm0, %v552_v0  ;;  %v450_v7 = vld [vmem:[%s661_s2] ss:$0 sm:$0xff] }
  0x2d   : > { %s448_s11 = sshll.u32 %s673_s19, 3  ;;  %467 = vmatpush3.bf16.msra.mxu0 %v505_v1  ;;  %475 = vmatpush3.bf16.msra.mxu1 %v507_v5  ;;  %v454_v15 = vld [vmem:[%s663_s4] ss:$0 sm:$0xff] }
  0x2e   : > { %s230_s14 = scalar_lea.vmem %s659_s0, %s448_s11  ;;  %468 = vmatprep.subr.bf16.mxu0 %v552_v0  ;;  %476 = vmatprep.subr.bf16.mxu1 %v552_v0  ;;  %s234_s27 = scalar_lea.vmem %s664_s5, %s448_s11 }
  0x2f   : > { %v236_v3 = vld [vmem:[%s230_s14] sm:$0xff] }
  0x30   : > { %v237_v4 = vpack.c.bf16 %v236_v3, %v236_v3 }
  0x31   : > { %469 = vmatpush3.bf16.msra.mxu0 %v506_v2  ;;  %477 = vmatpush3.bf16.msra.mxu1 %v508_v6 }
  0x34   : > { %471 = vmatmul.mubr.msk.bf16.vlgmr.msra.gmra.mrb[0].mxu0 %vm261_vm1, %v237_v4 }
 0x107   : > { %v299_v8 = vpop.f32.mrb[0].mxu0 }
 0x108   : > { %v300_v9 = vadd.f32 %v450_v7, %v299_v8  ;;  %v472_v10 = vpop.f32.mrb[1].mxu0 }
 0x109   : > { %v302_v11 = vpop.f32.mrb[2].mxu0 }
 0x10a   : > { %v305_v12 = vmax.f32 %v300_v9, 0.0  ;;  %v473_v13 = vpop.f32.mrb[3].mxu0 }
 0x10c   : > { %v306_v14 = vpack.c.bf16 %v305_v12, %v305_v12 }
 0x10e   : > { %479 = vmatmul.mubr.msk.bf16.vlgmr.msra.gmra.mrb[0].mxu1 %vm261_vm1, %v306_v14 }
 0x1e1   : > { %v367_v16 = vpop.f32.mrb[0].mxu1 }
 0x1e2   : > { %v368_v17 = vadd.f32 %v454_v15, %v367_v16  ;;  %v480_v18 = vpop.f32.mrb[1].mxu1 }
 0x1e3   : > { %v370_v19 = vpop.f32.mrb[2].mxu1 }
 0x1e4   : > { %v373_v20 = vmax.f32 %v368_v17, 0.0  ;;  %v481_v21 = vpop.f32.mrb[3].mxu1 }
 0x1e6   : > { %375 = vst.msk [vmem:[%s234_s27] sm:$0xff] %vm374_vm2, %v373_v20 }
 0x1e7 PF: > { %s16_s18 = sadd.s32 1, %s547_s18  }
 0x1e8   : > { %p13_p3 = scmp.ge.s32.totalorder %s16_s18, 5  }
 0x1ea   :  { %15 = sbr.rel (!%p13_p3) target bundleno = 1 (0x1), region = 75 }
 0x1f1   :  { %395 = vsyncpa [#allocation3], 1 }
 0x1f2   :  { %397 = vsyncpa [#allocation3 + $0x1], 1 }

// kernel: tpu_custom_call.1
= control target key start
LH: loop header
LB: loop body
LE: loop exit
PB: predicated region body
PF: predicated region fallthrough
CT: control target
= control target key end

     0   :  { %10 = vsyncpa [#allocation3], 0  ;;  %s584_s18 = smov 0   ;;  %s659_s0 = inlined_call_operand.vmem [shape: f32[20,32], index: 0, kind: input, shape index: {}]   ;;  %s660_s1 = inlined_call_operand.hbm [shape: bf16[32,32], index: 1, kind: input, shape index: {}]   ;;  %s661_s2 = inlined_call_operand.vmem [shape: f32[1,32], index: 2, kind: input, shape index: {}]   ;;  %s662_s3 = inlined_call_operand.vmem [shape: bf16[32,16], index: 3, kind: input, shape index: {}]   ;;  %s663_s4 = inlined_call_operand.vmem [shape: f32[1,16], index: 4, kind: input, shape index: {}]   ;;  %s664_s5 = inlined_call_operand.vmem [shape: f32[20,16], index: 5, kind: output, shape index: {}]  }
   0x1 LB: > { %s590_s19 = sadd.s32 4294967295, %s547_s18   ;;  %p443_p0 = scmp.ge.s32.totalorder %s547_s18, 1  ;;  %s547_s18 = sphi %s584_s18, %s16_s18  }
   0x2   : > { %p157_p1 = scmp.lt.s32.totalorder %s547_s18, 4  ;;  %s549_s20 = smov [#allocation2]  }
   0x3   : > { %s169_s21 = sshll.u32 %s549_s20, 4  ;;  %p665_p3 = scmp.eq.s32.totalorder %s590_s19, 0  ;;  %s170_s21 = int_to_ptr.vmem [resolvable:$true] %s169_s21 }
   0x4   : > { %p594_p2 = pnand %p443_p0, %p157_p1  ;;  %s509_s26 = scalar_lea.hbm %s660_s1, 256 }
   0x5   : > { %p510_p6 = scmp.ne.s32.totalorder %s660_s1, %s509_s26  ;;  %p516_p10 = scmp.lt.u32.totalorder %s509_s26, %s660_s1 }
   0x6   : > { %s667_s22 = scalar_select %p594_p2, 1, 0 }
   0x7   : > { %p486_p4 = pneg %p594_p2 }
   0x9   : > { %p603_p5 = pnand %p665_p3, %p486_p4 }
   0xb   : > { %p511_p7 = pneg %p603_p5 }
   0xd   : > { %p512_p8 = pnand %p511_p7, %p510_p6 }
   0xf   : > { %p513_p9 = pneg %p512_p8 }
  0x11   : > { %p518_p11 = pnand %p516_p10, %p513_p9 }
  0x13   : > { %521 = shalt.err (!%p518_p11)
}
  0x14   : > { %s522_s6 = scalar_lea.vmem %s170_s21, 256  ;;  %p530_p1 = scmp.lt.s32.totalorder %s170_s21, %s170_s21 }
  0x15   : > { %p523_p12 = scmp.ne.s32.totalorder %s170_s21, %s522_s6  ;;  %p531_p4 = scmp.lt.s32.totalorder %s522_s6, %s522_s6 }
  0x17   : > { %p525_p13 = pnand %p523_p12, %p511_p7  ;;  %p532_p3 = por %p531_p4, %p530_p1 }
  0x19   : > { %p526_p0 = pneg %p525_p13 }
  0x1b   : > { %p533_p2 = pnand %p532_p3, %p526_p0 }
  0x1d   : > { %536 = shalt.err (!%p533_p2)
}
  0x1e   : > { %s550_s7 = smov 64   ;;  %s551_s8 = smov 4  }
  0x1f   : > { %489 = dma.hbm_to_vmem [thread:$0]  (!%p603_p5), %s660_s1, 256, %s170_s21, [#allocation3], %s550_s7, %s550_s7, %s551_s8  }
  0x20   : > { %p669_p6 = scmp.ne.s32.totalorder %s667_s22, 0 }
  0x21   : > { %p670_p8 = scmp.eq.s32.totalorder (!%p669_p6), %s590_s19, 0 }
  0x22   : > { %201 = sbr.rel (%p669_p6) target bundleno = 487 (0x1e7), region = 40 }
  0x29   : > { %542 = dma.done.wait (%p670_p8), [#allocation3], 256   ;;  %p671_p7 = pmov %p670_p8 }
  0x2a   : > { %p227_p2 = scmp.lt.s32.totalorder %s590_s19, 2  ;;  %v552_v0 = vmov 0.0   ;;  %vm553_vm0 = vmmov 0   ;;  %v505_v1 = vld [vmem:[#allocation2] sm:$0xff]   ;;  %v506_v2 = vld [vmem:[#allocation2 + $0x8] sm:$0xff]   ;;  %vm261_vm1 = vcmask 261120  }
  0x2b   : > { %544 = vsyncadd (%p671_p7), [#allocation3], 4294967040  ;;  %466 = vmatprep.subr.bf16.mxu0 %v552_v0  ;;  %470 = vmatprep.mubr.msk.bf16.mxu0 %vm553_vm0, %v552_v0  ;;  %v507_v5 = vld [vmem:[%s662_s3] sm:$0xff]   ;;  %v508_v6 = vld [vmem:[%s662_s3 + $0x8] sm:$0xff]   ;;  %vm374_vm2 = vcmask 130048  }
  0x2c   : > { %s673_s19 = smov (!%p227_p2, %s590_s19), 2  ;;  %474 = vmatprep.subr.bf16.mxu1 %v552_v0  ;;  %478 = vmatprep.mubr.msk.bf16.mxu1 %vm553_vm0, %v552_v0  ;;  %v450_v7 = vld [vmem:[%s661_s2] ss:$0 sm:$0xff] }
  0x2d   : > { %s448_s11 = sshll.u32 %s673_s19, 3  ;;  %467 = vmatpush3.bf16.msra.mxu0 %v505_v1  ;;  %475 = vmatpush3.bf16.msra.mxu1 %v507_v5  ;;  %v454_v15 = vld [vmem:[%s663_s4] ss:$0 sm:$0xff] }
  0x2e   : > { %s230_s14 = scalar_lea.vmem %s659_s0, %s448_s11  ;;  %468 = vmatprep.subr.bf16.mxu0 %v552_v0  ;;  %476 = vmatprep.subr.bf16.mxu1 %v552_v0  ;;  %s234_s27 = scalar_lea.vmem %s664_s5, %s448_s11 }
  0x2f   : > { %v236_v3 = vld [vmem:[%s230_s14] sm:$0xff] }
  0x30   : > { %v237_v4 = vpack.c.bf16 %v236_v3, %v236_v3 }
  0x31   : > { %469 = vmatpush3.bf16.msra.mxu0 %v506_v2  ;;  %477 = vmatpush3.bf16.msra.mxu1 %v508_v6 }
  0x34   : > { %471 = vmatmul.mubr.msk.bf16.vlgmr.msra.gmra.mrb[0].mxu0 %vm261_vm1, %v237_v4 }
 0x107   : > { %v299_v8 = vpop.f32.mrb[0].mxu0 }
 0x108   : > { %v300_v9 = vadd.f32 %v450_v7, %v299_v8  ;;  %v472_v10 = vpop.f32.mrb[1].mxu0 }
 0x109   : > { %v302_v11 = vpop.f32.mrb[2].mxu0 }
 0x10a   : > { %v305_v12 = vmax.f32 %v300_v9, 0.0  ;;  %v473_v13 = vpop.f32.mrb[3].mxu0 }
 0x10c   : > { %v306_v14 = vpack.c.bf16 %v305_v12, %v305_v12 }
 0x10e   : > { %479 = vmatmul.mubr.msk.bf16.vlgmr.msra.gmra.mrb[0].mxu1 %vm261_vm1, %v306_v14 }
 0x1e1   : > { %v367_v16 = vpop.f32.mrb[0].mxu1 }
 0x1e2   : > { %v368_v17 = vadd.f32 %v454_v15, %v367_v16  ;;  %v480_v18 = vpop.f32.mrb[1].mxu1 }
 0x1e3   : > { %v370_v19 = vpop.f32.mrb[2].mxu1 }
 0x1e4   : > { %v373_v20 = vmax.f32 %v368_v17, 0.0  ;;  %v481_v21 = vpop.f32.mrb[3].mxu1 }
 0x1e6   : > { %375 = vst.msk [vmem:[%s234_s27] sm:$0xff] %vm374_vm2, %v373_v20 }
 0x1e7 PF: > { %s16_s18 = sadd.s32 1, %s547_s18  }
 0x1e8   : > { %p13_p3 = scmp.ge.s32.totalorder %s16_s18, 5  }
 0x1ea   :  { %15 = sbr.rel (!%p13_p3) target bundleno = 1 (0x1), region = 75 }
 0x1f1   :  { %395 = vsyncpa [#allocation3], 1 }
 0x1f2   :  { %397 = vsyncpa [#allocation3 + $0x1], 1 }

</bundles_post_ra>
